<compile_context>
chip_gen: v5e
topology: v5e:2x2
jax: 0.10.0
libtpu: 0.0.40
codegen_flags: <defaults>
</compile_context>

<pallas_src>
import functools

import jax
import jax.numpy as jnp
from jax.experimental import pallas as pl
from jax.experimental.pallas import tpu as pltpu

_LANE = 128
_SUBLANE = 8


def _round_up(a, b):
    return ((a + b - 1) // b) * b


def _concat_pool_kernel(x_ref, o_ref, mx_acc, sum_acc, *, true_l, l_tile, mask_tail):
    # x_ref:   (TN, TC, TL) input tile
    # o_ref:   (TN, 2, TC)  output tile (lane-dense along C), written only at last k
    # mx_acc / sum_acc: (TN, TC) float32 running accumulators (persist across k)
    k = pl.program_id(2)
    nk = pl.num_programs(2)

    @pl.when(k == 0)
    def _init():
        mx_acc[...] = jnp.full_like(mx_acc, -jnp.inf)
        sum_acc[...] = jnp.zeros_like(sum_acc)

    x = x_ref[...].astype(jnp.float32)  # accumulate in f32 (bf16-safe mean)

    if mask_tail:
        # Only the last L-block can be partial; mask OOB lanes (cost hidden under DMA).
        lane = jax.lax.broadcasted_iota(jnp.int32, x.shape, 2)
        valid = (k * l_tile + lane) < true_l
        x_max = jnp.where(valid, x, -jnp.inf)
        x_sum = jnp.where(valid, x, 0.0)
    else:
        x_max = x
        x_sum = x

    mx_acc[...] = jnp.maximum(mx_acc[...], jnp.max(x_max, axis=-1))
    sum_acc[...] = sum_acc[...] + jnp.sum(x_sum, axis=-1)

    @pl.when(k == nk - 1)
    def _finalize():
        o_ref[:, 0, :] = mx_acc[...].astype(o_ref.dtype)
        o_ref[:, 1, :] = (sum_acc[...] * (1.0 / true_l)).astype(o_ref.dtype)


def _choose_tiles(N, C, L, itemsize, budget_bytes):
    """Pick (TN, TC, TL) so one grid step's *padded* VMEM footprint (input block +
    resident output slab) stays under ~budget_bytes while respecting the TPU block
    constraints:
      input  block (TN, TC, TL): TC % 8   == 0 or TC == C;  TL % 128 == 0 or TL == L
      output block (TN, 2,  TC): TC % 128 == 0 or TC == C
    (TC is therefore either == C or a multiple of 128.)

    VMEM stores the last two dims in (8, 128) physical tiles, so footprints are
    computed on rounded-up dims — this is what keeps small-(C, L) / large-N cases
    from blowing past the VMEM limit."""
    budget = max(_SUBLANE * _LANE, budget_bytes // itemsize)  # elems per grid step

    in_plane = _round_up(C, _SUBLANE) * _round_up(L, _LANE)   # padded (C, L) slab
    out_plane = _SUBLANE * _round_up(C, _LANE)                # padded (2, C) slab

    if in_plane + out_plane <= budget:
        # Whole (C, L) plane fits: tile over batch only.
        TC, TL = C, L
        TN = max(1, min(N, budget // (in_plane + out_plane)))
    else:
        # Tile channels in 128-aligned chunks (keeps the output block lane-dense),
        # and the length axis too if a single (TC, L) slab is still too big.
        TN = 1
        TC = C if C <= _LANE else _LANE
        per_c = max(_LANE, budget // _round_up(TC, _SUBLANE))
        if _round_up(L, _LANE) <= per_c:
            TL = L
        else:
            TL = max(_LANE, (per_c // _LANE) * _LANE)
    return TN, TC, TL


def concat_pool(x, dim=1, block_budget_bytes=8 << 20):
    """Pallas ConcatPool forward. x: (N, C, L) float array."""
    assert dim == 1, "only dim=1 (the PyTorch default) is supported"
    N, C, L = x.shape
    itemsize = jnp.dtype(x.dtype).itemsize
    TN, TC, TL = _choose_tiles(N, C, L, itemsize, block_budget_bytes)
    gn, gc, gl = pl.cdiv(N, TN), pl.cdiv(C, TC), pl.cdiv(L, TL)

    kernel = functools.partial(
        _concat_pool_kernel, true_l=L, l_tile=TL, mask_tail=(L % TL != 0))

    pooled = pl.pallas_call(
        kernel,
        out_shape=jax.ShapeDtypeStruct((N, 2, C), x.dtype),
        grid_spec=pltpu.PrefetchScalarGridSpec(
            num_scalar_prefetch=0,
            grid=(gn, gc, gl),
            in_specs=[pl.BlockSpec((TN, TC, TL), lambda i, j, k: (i, j, k))],
            out_specs=pl.BlockSpec((TN, 2, TC), lambda i, j, k: (i, 0, j)),
            scratch_shapes=[
                pltpu.VMEM((TN, TC), jnp.float32),   # running max
                pltpu.VMEM((TN, TC), jnp.float32),   # running sum
            ],
        ),
        compiler_params=pltpu.CompilerParams(
            dimension_semantics=("parallel", "parallel", "arbitrary"),
            vmem_limit_bytes=32 << 20,
        ),
        cost_estimate=pl.CostEstimate(
            flops=2 * N * C * L,
            transcendentals=0,
            bytes_accessed=N * C * L * itemsize + 2 * N * C * itemsize,
        ),
    )(x)

    # Mirror torch's squeeze(dim=1) (no-op when C > 1) + cat(dim=1) exactly.
    if C == 1:
        return pooled.reshape(N, 2)            # (N, 2)
    return pooled.reshape(N, 2 * C, 1)         # (N, 2*C, 1): [max(C) | avg(C)]


def _reference(x):
    mx = jnp.max(x, axis=-1, keepdims=True)    # (N, C, 1)
    av = jnp.mean(x, axis=-1, keepdims=True)   # (N, C, 1)
    N, C, _ = x.shape
    if C == 1:
        return jnp.concatenate((mx[:, 0, :], av[:, 0, :]), axis=1)
    return jnp.concatenate((mx, av), axis=1)


if __name__ == "__main__":
    key = jax.random.PRNGKey(0)

    # Main case: C > 1 (squeeze is a no-op, output (N, 2*C, 1)).
    N, C, L = 2, 8, 16
    x = jax.random.normal(key, (N, C, L), dtype=jnp.float32)
    out = concat_pool(x)
    jax.block_until_ready(out)
    ref = _reference(x)
    assert out.shape == ref.shape, (out.shape, ref.shape)
    assert jnp.allclose(out, ref, atol=1e-5, rtol=1e-5), "mismatch vs reference (C>1)"

    # C == 1 case: squeeze collapses the channel dim, output (N, 2).
    x1 = jax.random.normal(jax.random.PRNGKey(1), (3, 1, 7), dtype=jnp.float32)
    out1 = concat_pool(x1)
    jax.block_until_ready(out1)
    ref1 = _reference(x1)
    assert out1.shape == ref1.shape, (out1.shape, ref1.shape)
    assert jnp.allclose(out1, ref1, atol=1e-5, rtol=1e-5), "mismatch vs reference (C==1)"

    # Forced-tiling case: tiny VMEM budget -> L is split into 128-wide blocks with a
    # masked tail (exercises the accumulator + tail-mask path at small shapes).
    x2 = jax.random.normal(jax.random.PRNGKey(2), (2, 16, 300), dtype=jnp.float32)
    out2 = concat_pool(x2, block_budget_bytes=16 << 10)
    jax.block_until_ready(out2)
    ref2 = _reference(x2)
    assert out2.shape == ref2.shape, (out2.shape, ref2.shape)
    assert jnp.allclose(out2, ref2, atol=1e-5, rtol=1e-5), "mismatch vs reference (tiled L)"

    print("KERNEL_OK")
</pallas_src>

<mosaic_0001>
module attributes {stable_mosaic.version = 11 : i64} {
  func.func @_concat_pool_kernel(%arg0: i32, %arg1: i32, %arg2: i32, %arg3: memref<2x8x16xf32, #tpu.memory_space<vmem>>, %arg4: memref<2x2x8xf32, #tpu.memory_space<vmem>>, %arg5: memref<2x8xf32, #tpu.memory_space<vmem>>, %arg6: memref<2x8xf32, #tpu.memory_space<vmem>>) attributes {dimension_semantics = [#tpu.dimension_semantics<parallel>, #tpu.dimension_semantics<parallel>, #tpu.dimension_semantics<arbitrary>], iteration_bounds = array<i64: 1, 1, 1>, scalar_prefetch = 0 : i64, scratch_operands = 2 : i64, tpu.core_type = #tpu.core_type<tc>, window_params = [{transform_indices = @transform_0, window_bounds = array<i64: 2, 8, 16>}, {transform_indices = @transform_1, window_bounds = array<i64: 2, 2, 8>}]} {
    %c0_i32 = arith.constant 0 : i32
    %0 = arith.cmpi eq, %arg2, %c0_i32 : i32
    %1 = arith.extui %0 : i1 to i32
    %c0_i32_0 = arith.constant 0 : i32
    %2 = arith.cmpi ne, %1, %c0_i32_0 : i32
    scf.if %2 {
      %cst_14 = arith.constant 0xFF800000 : f32
      %15 = vector.broadcast %cst_14 : f32 to vector<2x8xf32>
      %c0_15 = arith.constant 0 : index
      %c0_16 = arith.constant 0 : index
      %16 = vector.load %arg5[%c0_15, %c0_16] : memref<2x8xf32, #tpu.memory_space<vmem>>, vector<2x8xf32>
      tpu.vector_store %arg5[%c0_15, %c0_16], %15 {strides = array<i32>} : memref<2x8xf32, #tpu.memory_space<vmem>>, vector<2x8xf32>,
      %cst_17 = arith.constant 0.000000e+00 : f32
      %17 = vector.broadcast %cst_17 : f32 to vector<2x8xf32>
      %c0_18 = arith.constant 0 : index
      %c0_19 = arith.constant 0 : index
      %18 = vector.load %arg6[%c0_18, %c0_19] : memref<2x8xf32, #tpu.memory_space<vmem>>, vector<2x8xf32>
      tpu.vector_store %arg6[%c0_18, %c0_19], %17 {strides = array<i32>} : memref<2x8xf32, #tpu.memory_space<vmem>>, vector<2x8xf32>,
    } else {
    }
    %c0 = arith.constant 0 : index
    %c0_1 = arith.constant 0 : index
    %c0_2 = arith.constant 0 : index
    %3 = vector.load %arg3[%c0, %c0_1, %c0_2] : memref<2x8x16xf32, #tpu.memory_space<vmem>>, vector<2x8x16xf32>
    %c0_3 = arith.constant 0 : index
    %c0_4 = arith.constant 0 : index
    %4 = vector.load %arg5[%c0_3, %c0_4] : memref<2x8xf32, #tpu.memory_space<vmem>>, vector<2x8xf32>
    %cst = arith.constant dense<0xFF800000> : vector<2x8xf32>
    %5 = vector.multi_reduction <maximumf>, %3, %cst [2] : vector<2x8x16xf32> to vector<2x8xf32>
    %6 = arith.maximumf %4, %5 : vector<2x8xf32>
    %c0_5 = arith.constant 0 : index
    %c0_6 = arith.constant 0 : index
    %7 = vector.load %arg5[%c0_5, %c0_6] : memref<2x8xf32, #tpu.memory_space<vmem>>, vector<2x8xf32>
    tpu.vector_store %arg5[%c0_5, %c0_6], %6 {strides = array<i32>} : memref<2x8xf32, #tpu.memory_space<vmem>>, vector<2x8xf32>,
    %c0_7 = arith.constant 0 : index
    %c0_8 = arith.constant 0 : index
    %8 = vector.load %arg6[%c0_7, %c0_8] : memref<2x8xf32, #tpu.memory_space<vmem>>, vector<2x8xf32>
    %cst_9 = arith.constant dense<0.000000e+00> : vector<2x8xf32>
    %9 = vector.multi_reduction <add>, %3, %cst_9 [2] : vector<2x8x16xf32> to vector<2x8xf32>
    %10 = arith.addf %8, %9 : vector<2x8xf32>
    %c0_10 = arith.constant 0 : index
    %c0_11 = arith.constant 0 : index
    %11 = vector.load %arg6[%c0_10, %c0_11] : memref<2x8xf32, #tpu.memory_space<vmem>>, vector<2x8xf32>
    tpu.vector_store %arg6[%c0_10, %c0_11], %10 {strides = array<i32>} : memref<2x8xf32, #tpu.memory_space<vmem>>, vector<2x8xf32>,
    %c0_i32_12 = arith.constant 0 : i32
    %12 = arith.cmpi eq, %arg2, %c0_i32_12 : i32
    %13 = arith.extui %12 : i1 to i32
    %c0_i32_13 = arith.constant 0 : i32
    %14 = arith.cmpi ne, %13, %c0_i32_13 : i32
    scf.if %14 {
      %c0_14 = arith.constant 0 : index
      %c0_15 = arith.constant 0 : index
      %15 = vector.load %arg5[%c0_14, %c0_15] : memref<2x8xf32, #tpu.memory_space<vmem>>, vector<2x8xf32>
      %c0_16 = arith.constant 0 : index
      %c0_17 = arith.constant 0 : index
      %c0_18 = arith.constant 0 : index
      %16 = vector.load %arg4[%c0_16, %c0_17, %c0_18] : memref<2x2x8xf32, #tpu.memory_space<vmem>>, vector<2x1x8xf32>
      %17 = vector.shape_cast %16 : vector<2x1x8xf32> to vector<2x8xf32>
      %18 = vector.shape_cast %15 : vector<2x8xf32> to vector<2x1x8xf32>
      tpu.vector_store %arg4[%c0_16, %c0_17, %c0_18], %18 {strides = array<i32>} : memref<2x2x8xf32, #tpu.memory_space<vmem>>, vector<2x1x8xf32>,
      %c0_19 = arith.constant 0 : index
      %c0_20 = arith.constant 0 : index
      %19 = vector.load %arg6[%c0_19, %c0_20] : memref<2x8xf32, #tpu.memory_space<vmem>>, vector<2x8xf32>
      %cst_21 = arith.constant 6.250000e-02 : f32
      %20 = vector.broadcast %cst_21 : f32 to vector<2x8xf32>
      %21 = arith.mulf %19, %20 : vector<2x8xf32>
      %c0_22 = arith.constant 0 : index
      %c1 = arith.constant 1 : index
      %c0_23 = arith.constant 0 : index
      %22 = vector.load %arg4[%c0_22, %c1, %c0_23] : memref<2x2x8xf32, #tpu.memory_space<vmem>>, vector<2x1x8xf32>
      %23 = vector.shape_cast %22 : vector<2x1x8xf32> to vector<2x8xf32>
      %24 = vector.shape_cast %21 : vector<2x8xf32> to vector<2x1x8xf32>
      tpu.vector_store %arg4[%c0_22, %c1, %c0_23], %24 {strides = array<i32>} : memref<2x2x8xf32, #tpu.memory_space<vmem>>, vector<2x1x8xf32>,
    } else {
    }
    return
  }
  func.func @transform_0(%arg0: i32, %arg1: i32, %arg2: i32) -> (i32, i32, i32) {
    %c0_i32 = arith.constant 0 : i32
    return %arg0, %arg1, %arg2 : i32, i32, i32
  }
  func.func @transform_1(%arg0: i32, %arg1: i32, %arg2: i32) -> (i32, i32, i32) {
    %c0_i32 = arith.constant 0 : i32
    %c0_i32_0 = arith.constant 0 : i32
    return %arg0, %c0_i32, %arg1 : i32, i32, i32
  }
}

</mosaic_0001>

<bundles_post_ra>
// kernel: tpu_custom_call.1
= control target key start
LH: loop header
LB: loop body
LE: loop exit
PB: predicated region body
PF: predicated region fallthrough
CT: control target
= control target key end

     0   :  { %6 = vsyncpa [#allocation5], 0  ;;  %s193_s0 = inlined_call_operand.hbm [shape: f32[2,8,16], index: 0, kind: input, shape index: {}]   ;;  %s194_s1 = inlined_call_operand.hbm [shape: f32[2,2,8], index: 1, kind: output, shape index: {}]  }
   0x1   :  { %7 = vsyncpa [#allocation6], 0  ;;  %s12_s8 = sshll.u32 %s193_s0, 4  ;;  %s165_s9 = smov [#allocation4]   ;;  %s13_s8 = int_to_ptr.hbm [resolvable:$true] %s12_s8 }
   0x2   :  { %s14_s10 = sshll.u32 %s165_s9, 4  ;;  %s166_s11 = smov 128   ;;  %s15_s10 = int_to_ptr.vmem [resolvable:$true] %s14_s10 }
   0x3   :  { %s167_s12 = smov 8  }
   0x4   :  { %20 = dma.hbm_to_vmem [thread:$0]  %s13_s8, 256, %s15_s10, [#allocation5], %s166_s11, %s166_s11, %s167_s12  }
   0x5   :  { %161 = dma.done.wait [#allocation5], 256  }
   0x6   :  { %162 = vsyncadd [#allocation5], 4294967040  ;;  %vm35_vm0 = vcmask 130048   ;;  %v32_v0 = vld [vmem:[#allocation4] sm:$0xff]  ;;  %v33_v3 = vld [vmem:[#allocation4 + $0x8] sm:$0xff]  ;;  %vm29_vm1 = vcmask 58368   ;;  %v44_v10 = vlaneseq }
   0x7   :  { %v55_v1 = vsel %vm35_vm0, %v32_v0, 0.0  ;;  %v36_v2 = vsel %vm35_vm0, %v32_v0, -inf  ;;  %v58_v4 = vsel %vm35_vm0, %v33_v3, 0.0  ;;  %v39_v5 = vsel %vm35_vm0, %v33_v3, -inf  ;;  %s170_s0 = smov [#allocation7]   ;;  %s92_s16 = sshll.u32 %s194_s1, 4  ;;  %s93_s16 = int_to_ptr.hbm [resolvable:$true] %s92_s16 }
   0x8   :  { %56 = vadd.xlane.f32.xlu0 %v55_v1  ;;  %37 = vmax.xlane.f32.xlu1 %v36_v2  ;;  %v168_v6 = vmov 0.0   ;;  %v169_v7 = vmov -inf   ;;  %v45_v11 = vand.u32 127, %v44_v10  ;;  %vm48_vm2 = vcmask 1041409   ;;  %s90_s13 = sshll.u32 %s170_s0, 4  ;;  %s171_s17 = smov 32   ;;  %s91_s13 = int_to_ptr.vmem [resolvable:$true] %s90_s13 }
   0x9   :  { %31 = vst.msk [vmem:[#allocation3] sm:$0x3] %vm29_vm1, %v168_v6  ;;  %vm76_vm3 = vcmask 57344   ;;  %s172_s18 = smov 2  }
   0xa   :  { %30 = vst.msk [vmem:[#allocation2] sm:$0x3] %vm29_vm1, %v169_v7 }
  0x10   :  { %59 = vadd.xlane.f32.xlu0 %v58_v4  ;;  %40 = vmax.xlane.f32.xlu1 %v39_v5  ;;  %v54_v16 = vld [vmem:[#allocation3] sm:$0x3] }
  0x11   :  { %v34_v18 = vld [vmem:[#allocation2] sm:$0x3] }
  0x7b   :  { %v57_v8 = vpop.xlane.xlu0 %56  ;;  %v38_v9 = vpop.xlane.xlu1 %37 }
  0x7c   :  { %v63_v14 = vperm.slane %v57_v8, %v45_v11  ;;  %v46_v15 = vperm.slane %v38_v9, %v45_v11 }
  0x83   :  { %v60_v12 = vpop.xlane.xlu0 %59  ;;  %v41_v13 = vpop.xlane.xlu1 %40 }
  0x84   :  { %v64_v17 = vperm.slane %v60_v12, %v45_v11  ;;  %v47_v19 = vperm.slane %v41_v13, %v45_v11 }
  0x86   :  { %v65_v20 = vsel %vm48_vm2, %v64_v17, %v63_v14  ;;  %v49_v21 = vsel %vm48_vm2, %v47_v19, %v46_v15 }
  0x87   :  { %v67_v22 = vadd.f32 %v65_v20, %v54_v16  ;;  %v51_v23 = vmax.f32 %v34_v18, %v49_v21 }
  0x89   :  { %68 = vst.msk [vmem:[#allocation3] sm:$0x3] %vm29_vm1, %v67_v22 }
  0x8a   :  { %53 = vst.msk [vmem:[#allocation2] sm:$0x3] %vm29_vm1, %v51_v23 }
  0x90   :  { %v79_v24 = vld [vmem:[#allocation3] sm:$0x3] }
  0x91   :  { %v72_v25 = vld [vmem:[#allocation2] sm:$0x3]  ;;  %v80_v26 = vmul.f32 0.0625, %v79_v24 }
  0x92   :  { %v74_v27 = vrot.slane %v72_v25, 1  ;;  %77 = vst.msk [vmem:[#allocation7] sm:$0x1] %vm76_vm3, %v72_v25 }
  0x93   :  { %v82_v28 = vrot.slane %v80_v26, 1  ;;  %84 = vst.msk [vmem:[#allocation7 + $0x1] sm:$0x1] %vm76_vm3, %v80_v26 }
  0x94   :  { %78 = vst.msk [vmem:[#allocation7 + $0x2] sm:$0x1] %vm76_vm3, %v74_v27 }
  0x95   :  { %85 = vst.msk [vmem:[#allocation7 + $0x3] sm:$0x1] %vm76_vm3, %v82_v28 }
  0x96   :  { %98 = dma.vmem_to_hbm [thread:$0]  %s91_s13, 64, %s93_s16, [#allocation6], %s171_s17, %s171_s17, %s172_s18  }
  0x97   :  { %163 = dma.done.wait [#allocation6], 64  }
  0x98   :  { %164 = vsyncadd [#allocation6], 4294967232 }
  0x99   :  { %103 = vsyncpa [#allocation5], 1 }
  0x9a   :  { %104 = vsyncpa [#allocation6], 1 }

</bundles_post_ra>
